<compile_context>
chip_gen: v7x
topology: tpu7x:2x2x1
jax: 0.10.0
libtpu: 0.0.40
codegen_flags: <defaults>
</compile_context>

<pallas_src>
import jax
import jax.numpy as jnp
from jax import lax
from jax.experimental import pallas as pl
from jax.experimental.pallas import tpu as pltpu

LANES = 128
SUBLANES = 8
ROWS_PER_STEP = 64  # 8 f32 vregs per inner fori_loop step


def _is_v7x():
    try:
        kind = jax.devices()[0].device_kind.lower()
    except Exception:
        return False
    return ("v7" in kind) or ("tpu7" in kind)


def _fused_kernel(x_ref, o_ref):
    """Single pass: whole (rows, 128) tensor resident in VMEM (2N HBM bytes)."""
    x = x_ref[...].astype(jnp.float32)
    mn = jnp.min(x)
    mx = jnp.max(x)
    degenerate = jnp.logical_and(mn == 0.0, mx == 0.0)
    offset = jnp.where(degenerate, 0.0, mn)
    scale = jnp.where(degenerate, 1.0, 1.0 / (mx - mn))  # NaN for const-nonzero: matches torch
    o_ref[...] = ((x - offset) * scale).astype(o_ref.dtype)


def _make_reduce_kernel(*, rows, row_tile, bpp, num_blocks, need_mask):
    """Pass 1: per-part (per-TensorCore) min/max with vreg-resident accumulators."""
    chunks_per_step = ROWS_PER_STEP // SUBLANES
    n_steps = row_tile // ROWS_PER_STEP

    def kernel(x_ref, part_ref, min_acc, max_acc):
        c = pl.program_id(0)  # megacore part ("parallel")
        i = pl.program_id(1)  # block within part ("arbitrary")

        @pl.when(i == 0)
        def _init():
            min_acc[...] = jnp.full(min_acc.shape, jnp.inf, dtype=jnp.float32)
            max_acc[...] = jnp.full(max_acc.shape, -jnp.inf, dtype=jnp.float32)

        if need_mask:
            # Actual (clamped) block index -> first row held in this VMEM block.
            blk = jnp.minimum(c * bpp + i, num_blocks - 1)
            row0 = blk * row_tile
            iota8 = lax.broadcasted_iota(jnp.int32, (SUBLANES, LANES), 0)

        def body(j, carry):
            mn0, mx0, mn1, mx1 = carry
            for t in range(chunks_per_step):
                off = j * ROWS_PER_STEP + t * SUBLANES
                start = pl.multiple_of(off, SUBLANES)
                sl = x_ref[pl.ds(start, SUBLANES), :].astype(jnp.float32)
                if need_mask:
                    valid = (row0 + off + iota8) < rows
                    sl_min = jnp.where(valid, sl, jnp.inf)
                    sl_max = jnp.where(valid, sl, -jnp.inf)
                else:
                    sl_min = sl
                    sl_max = sl
                # Two interleaved accumulator chains keep the VPU dep-chain short.
                if t % 2 == 0:
                    mn0 = jnp.minimum(mn0, sl_min)
                    mx0 = jnp.maximum(mx0, sl_max)
                else:
                    mn1 = jnp.minimum(mn1, sl_min)
                    mx1 = jnp.maximum(mx1, sl_max)
            return mn0, mx0, mn1, mx1

        init = (min_acc[...], max_acc[...],
                jnp.full((SUBLANES, LANES), jnp.inf, jnp.float32),
                jnp.full((SUBLANES, LANES), -jnp.inf, jnp.float32))
        mn0, mx0, mn1, mx1 = lax.fori_loop(0, n_steps, body, init)
        min_acc[...] = jnp.minimum(mn0, mn1)
        max_acc[...] = jnp.maximum(mx0, mx1)

        @pl.when(i == pl.num_programs(1) - 1)
        def _finalize():
            # Single cross-lane reduce of one vreg per part; scalars go to SMEM.
            part_ref[0, 0] = jnp.min(min_acc[...])
            part_ref[0, 1] = jnp.max(max_acc[...])

    return kernel


def _make_apply_kernel(nparts):
    """Pass 2: combine tiny per-part partials (scalar prologue) and normalize."""

    def kernel(part_ref, x_ref, o_ref):
        mn = part_ref[0, 0]
        mx = part_ref[0, 1]
        for p in range(1, nparts):
            mn = jnp.minimum(mn, part_ref[p, 0])
            mx = jnp.maximum(mx, part_ref[p, 1])
        degenerate = jnp.logical_and(mn == 0.0, mx == 0.0)
        offset = jnp.where(degenerate, 0.0, mn)
        scale = jnp.where(degenerate, 1.0, 1.0 / (mx - mn))
        o_ref[...] = ((x_ref[...].astype(jnp.float32) - offset) * scale).astype(o_ref.dtype)

    return kernel


def norm(x, *, row_tile=4096, fuse_bytes=None):
    orig_shape = x.shape
    orig_dtype = x.dtype
    n = int(x.size)
    if n == 0:
        return x

    is_v7 = _is_v7x()
    if fuse_bytes is None:
        # v5e/v6e: 128 MiB physical VMEM -> fuse aggressively (2N vs 3N HBM bytes).
        # v7x: 64 MiB VMEM + 2 TensorCores -> prefer the dual-core two-pass path.
        fuse_bytes = (4 << 20) if is_v7 else (24 << 20)
    vmem_cap = (48 << 20) if is_v7 else (100 << 20)

    flat = x.reshape(-1)
    n_lane = (-(-n // LANES)) * LANES
    padded = n_lane != n
    if padded:
        # TODO(synk): flat lengths that are not a multiple of 128 (rare for image
        # batches) still pay one pad copy; a ragged 1-D BlockSpec would remove it.
        flat = jnp.concatenate(
            [flat, jnp.full((n_lane - n,), flat[0], dtype=flat.dtype)])
    rows = n_lane // LANES
    x2 = flat.reshape(rows, LANES)  # free, lane-dense view in the common case
    itemsize = x.dtype.itemsize

    if n * 4 <= fuse_bytes:
        # ---- fused single-pass path ----------------------------------------
        fused_vmem = min(vmem_cap, max(32 << 20, 16 * n))
        out2 = pl.pallas_call(
            _fused_kernel,
            out_shape=jax.ShapeDtypeStruct((rows, LANES), orig_dtype),
            compiler_params=pltpu.CompilerParams(vmem_limit_bytes=fused_vmem),
        )(x2)
    else:
        # ---- two-pass tiled path --------------------------------------------
        row_tile = max(ROWS_PER_STEP, (row_tile // ROWS_PER_STEP) * ROWS_PER_STEP)
        row_tile = min(row_tile, (-(-rows // ROWS_PER_STEP)) * ROWS_PER_STEP)

        num_blocks = -(-rows // row_tile)
        nparts = 2 if num_blocks >= 2 else 1      # split pass 1 across TensorCores
        bpp = -(-num_blocks // nparts)            # blocks per part
        need_mask = (nparts * bpp * row_tile) != rows

        blk_bytes = row_tile * LANES * max(itemsize, 4)
        tiled_vmem = min(vmem_cap, max(32 << 20, 6 * blk_bytes + (2 << 20)))

        in_block = pl.BlockSpec(
            (row_tile, LANES),
            lambda c, i: (jnp.minimum(c * bpp + i, num_blocks - 1), 0))

        partials = pl.pallas_call(
            _make_reduce_kernel(rows=rows, row_tile=row_tile, bpp=bpp,
                                num_blocks=num_blocks, need_mask=need_mask),
            out_shape=jax.ShapeDtypeStruct((nparts, 2), jnp.float32),
            grid=(nparts, bpp),
            in_specs=[in_block],
            out_specs=pl.BlockSpec((1, 2), lambda c, i: (c, 0),
                                   memory_space=pltpu.SMEM),
            scratch_shapes=[
                pltpu.VMEM((SUBLANES, LANES), jnp.float32),
                pltpu.VMEM((SUBLANES, LANES), jnp.float32),
            ],
            compiler_params=pltpu.CompilerParams(
                dimension_semantics=("parallel", "arbitrary"),
                vmem_limit_bytes=tiled_vmem),
            cost_estimate=pl.CostEstimate(
                flops=2 * n, transcendentals=0,
                bytes_accessed=n * itemsize + 8 * nparts),
        )(x2)

        io_block = pl.BlockSpec((row_tile, LANES), lambda i: (i, 0))
        # NOTE: input_output_aliases={1: 0} is intentionally NOT used here: in the
        # common (unpadded) case x2 aliases the caller's input buffer, so in-place
        # clobbering (or the protective copy XLA would insert) costs more than it saves.
        out2 = pl.pallas_call(
            _make_apply_kernel(nparts),
            out_shape=jax.ShapeDtypeStruct((rows, LANES), orig_dtype),
            grid=(num_blocks,),
            in_specs=[pl.BlockSpec(memory_space=pltpu.SMEM), io_block],
            out_specs=io_block,
            compiler_params=pltpu.CompilerParams(
                dimension_semantics=("parallel",),
                vmem_limit_bytes=tiled_vmem),
            cost_estimate=pl.CostEstimate(
                flops=2 * n, transcendentals=0,
                bytes_accessed=2 * n * itemsize + 8 * nparts),
        )(partials, x2)

    out_flat = out2.reshape(-1)
    if padded:
        out_flat = out_flat[:n]
    return out_flat.reshape(orig_shape)


def _ref_norm(x):
    mn = jnp.min(x)
    mx = jnp.max(x)
    degenerate = jnp.logical_and(mn == 0.0, mx == 0.0)
    return jnp.where(degenerate, x, (x - mn) / (mx - mn))


if __name__ == "__main__":
    key = jax.random.PRNGKey(0)

    # Small NCHW input (what the FFCV dataloader feeds this module): fused path.
    x = jax.random.normal(key, (2, 4, 16, 16), dtype=jnp.float32)
    y = jax.block_until_ready(norm(x))
    assert jnp.allclose(y, _ref_norm(x), atol=1e-6), "fused path mismatch"

    # All-zeros input: degenerate branch returns the input unchanged.
    zeros = jnp.zeros((2, 4, 16, 16), jnp.float32)
    y0 = jax.block_until_ready(norm(zeros))
    assert jnp.array_equal(y0, zeros), "degenerate path mismatch"

    # Medium input forced down the two-pass path with an uneven tiling
    # (exercises ragged-tail masking, clamped duplicate block on part 1,
    # per-part SMEM partials, and the apply pass with a partial last block).
    x_med = jax.random.normal(jax.random.PRNGKey(1), (8, 3, 64, 64), dtype=jnp.float32)
    y_med = jax.block_until_ready(norm(x_med, row_tile=320, fuse_bytes=0))
    assert jnp.allclose(y_med, _ref_norm(x_med), atol=1e-6), "tiled path mismatch"

    print("KERNEL_OK")
</pallas_src>

<mosaic_0001>
module attributes {stable_mosaic.version = 11 : i64} {
  func.func @_fused_kernel(%arg0: memref<16x128xf32, #tpu.memory_space<vmem>>, %arg1: memref<16x128xf32, #tpu.memory_space<vmem>>) attributes {dimension_semantics = [], scalar_prefetch = 0 : i64, scratch_operands = 0 : i64, tpu.core_type = #tpu.core_type<tc>} {
    %c0 = arith.constant 0 : index
    %c0_0 = arith.constant 0 : index
    %0 = vector.load %arg0[%c0, %c0_0] : memref<16x128xf32, #tpu.memory_space<vmem>>, vector<16x128xf32>
    %1 = vector.shape_cast %0 : vector<16x128xf32> to vector<1x16x128xf32>
    %cst = arith.constant dense<0x7F800000> : vector<1xf32>
    %2 = vector.multi_reduction <minimumf>, %1, %cst [1, 2] : vector<1x16x128xf32> to vector<1xf32>
    %3 = vector.shape_cast %2 : vector<1xf32> to vector<1x1x1xf32>
    %4 = vector.extract %3[0, 0, 0] : f32 from vector<1x1x1xf32>
    %5 = vector.shape_cast %0 : vector<16x128xf32> to vector<1x16x128xf32>
    %cst_1 = arith.constant dense<0xFF800000> : vector<1xf32>
    %6 = vector.multi_reduction <maximumf>, %5, %cst_1 [1, 2] : vector<1x16x128xf32> to vector<1xf32>
    %7 = vector.shape_cast %6 : vector<1xf32> to vector<1x1x1xf32>
    %8 = vector.extract %7[0, 0, 0] : f32 from vector<1x1x1xf32>
    %cst_2 = arith.constant 0.000000e+00 : f32
    %9 = arith.cmpf oeq, %4, %cst_2 : f32
    %cst_3 = arith.constant 0.000000e+00 : f32
    %10 = arith.cmpf oeq, %8, %cst_3 : f32
    %11 = arith.andi %9, %10 : i1
    %cst_4 = arith.constant 0.000000e+00 : f32
    %12 = arith.select %11, %cst_4, %4 : f32
    %13 = arith.subf %8, %4 : f32
    %cst_5 = arith.constant 1.000000e+00 : f32
    %14 = arith.divf %cst_5, %13 : f32
    %cst_6 = arith.constant 1.000000e+00 : f32
    %15 = arith.select %11, %cst_6, %14 : f32
    %16 = vector.broadcast %12 : f32 to vector<16x128xf32>
    %17 = arith.subf %0, %16 : vector<16x128xf32>
    %18 = vector.broadcast %15 : f32 to vector<16x128xf32>
    %19 = arith.mulf %17, %18 : vector<16x128xf32>
    %c0_7 = arith.constant 0 : index
    %c0_8 = arith.constant 0 : index
    %20 = vector.load %arg1[%c0_7, %c0_8] : memref<16x128xf32, #tpu.memory_space<vmem>>, vector<16x128xf32>
    tpu.vector_store %arg1[%c0_7, %c0_8], %19 {strides = array<i32>} : memref<16x128xf32, #tpu.memory_space<vmem>>, vector<16x128xf32>,
    return
  }
}

</mosaic_0001>

<bundles_post_ra>
// kernel: tpu_custom_call.1
= control target key start
LH: loop header
LB: loop body
LE: loop exit
PB: predicated region body
PF: predicated region fallthrough
CT: control target
= control target key end

     0   :  { %6 = vsyncpa [#allocation3], 0  ;;  %s186_s0 = inlined_call_operand.hbm [shape: f32[16,128], index: 0, kind: input, shape index: {}]   ;;  %s187_s1 = inlined_call_operand.hbm [shape: f32[16,128], index: 1, kind: output, shape index: {}]  }
   0x1   :  { %7 = vsyncpa [#allocation4], 0  ;;  %s142_s6 = smov [#allocation2]   ;;  %s94_s10 = scalar_lea.hbm %s186_s0, 256 }
   0x2   :  { %s13_s7 = sshll.u32 %s142_s6, 4  ;;  %p95_p0 = scmp.ne.s32.totalorder %s186_s0, %s94_s10  ;;  %s14_s7 = int_to_ptr.vmem [resolvable:$true] %s13_s7 }
   0x3   :  { %p98_p1 = scmp.lt.u32.totalorder %s94_s10, %s186_s0 }
   0x5   :  { %p100_p2 = pnand %p98_p1, %p95_p0 }
   0x7   :  { %103 = shalt.err (!%p100_p2)
}
   0x8   :  { %s104_s15 = scalar_lea.vmem %s14_s7, 256  ;;  %p109_p4 = scmp.lt.s32.totalorder %s14_s7, %s14_s7 }
   0x9   :  { %p105_p3 = scmp.ne.s32.totalorder %s14_s7, %s104_s15  ;;  %p110_p5 = scmp.lt.s32.totalorder %s104_s15, %s104_s15 }
   0xb   :  { %p111_p6 = por %p110_p5, %p109_p4 }
   0xd   :  { %p112_p7 = pnand %p111_p6, %p105_p3 }
   0xf   :  { %115 = shalt.err (!%p112_p7)
}
  0x10   :  { %s143_s16 = smov 128   ;;  %s144_s17 = smov 8  }
  0x11   :  { %19 = dma.hbm_to_vmem [thread:$0]  %s186_s0, 256, %s14_s7, [#allocation3], %s143_s16, %s143_s16, %s144_s17  }
  0x12   :  { %138 = dma.done.wait [#allocation3], 256  }
  0x13   :  { %139 = vsyncadd [#allocation3], 4294967040  ;;  %v23_v0 = vld [vmem:[#allocation2] sm:$0xff]  ;;  %v24_v1 = vld [vmem:[#allocation2 + $0x8] sm:$0xff]  ;;  %s145_s23 = smov [#allocation5]  }
  0x14   :  { %v25_v2 = vmin.f32 %v23_v0, %v24_v1  ;;  %v35_v3 = vmax.f32 %v23_v0, %v24_v1  ;;  %s68_s24 = sshll.u32 %s145_s23, 4  ;;  %s69_s24 = int_to_ptr.vmem [resolvable:$true] %s68_s24 }
  0x15   :  { %s116_s25 = scalar_lea.vmem %s69_s24, 256  ;;  %p121_p12 = scmp.lt.s32.totalorder %s69_s24, %s69_s24 }
  0x16   :  { %26 = vmin.xlane.f32.xlu0 %v25_v2  ;;  %p117_p11 = scmp.ne.s32.totalorder %s69_s24, %s116_s25  ;;  %p122_p13 = scmp.lt.s32.totalorder %s116_s25, %s116_s25 }
  0x18   :  { %p123_p0 = por %p122_p13, %p121_p12 }
  0x1a   :  { %36 = vmax.xlane.f32.xlu0 %v35_v3  ;;  %p124_p1 = pnand %p123_p0, %p117_p11 }
  0xa3   :  { %v27_v4 = vpop.xlane.xlu0 %26 }
  0xa4   :  { %v28_v5 = vrot.slane %v27_v4, 4 }
  0xa6   :  { %v29_v6 = vmin.f32 %v27_v4, %v28_v5 }
  0xa7   :  { %v37_v7 = vpop.xlane.xlu0 %36 }
  0xa8   :  { %v30_v8 = vrot.slane %v29_v6, 2  ;;  %v38_v9 = vrot.slane %v37_v7, 4 }
  0xaa   :  { %v39_v10 = vmax.f32 %v37_v7, %v38_v9  ;;  %v31_v11 = vmin.f32 %v29_v6, %v30_v8 }
  0xac   :  { %v40_v12 = vrot.slane %v39_v10, 2  ;;  %v32_v13 = vrot.slane %v31_v11, 1 }
  0xae   :  { %v41_v14 = vmax.f32 %v39_v10, %v40_v12  ;;  %v33_v15 = vmin.f32 %v31_v11, %v32_v13 }
  0xb0   :  { %82 = vpush %v33_v15  ;;  %v42_v16 = vrot.slane %v41_v14, 1 }
  0xb2   :  { %v43_v17 = vmax.f32 %v41_v14, %v42_v16 }
  0xb4   :  { %84 = vpush %v43_v17 }
  0xe1   :  { %s83_s0 = spop %82 }
  0xe2   :  { %p45_p9 = scmp.eq.f32.partialorder %s83_s0, 0.0 }
  0xe5   :  { %s85_s20 = spop %84 }
  0xe6   :  { %s50_s21 = ssub.f32 %s85_s20, %s83_s0  ;;  %p46_p8 = scmp.eq.f32.partialorder %s85_s20, 0.0 }
  0xe8   :  { %v51_v18 = vstv %s50_s21  ;;  %p47_p10 = pnand %p46_p8, %p45_p9 }
  0xe9   :  { %92 = vrcp.f32 %v51_v18 }
  0xea   :  { %s189_s0 = smov (!%p47_p10, %s83_s0), 0.0 }
  0xeb   :  { %v55_v20 = vstv %s189_s0 }
  0xec   :  { %v56_v21 = vsub.f32 %v23_v0, %v55_v20  ;;  %v57_v22 = vsub.f32 %v24_v1, %v55_v20 }
  0xf3   :  { %v93_v19 = vpop.eup %92 }
  0xf4   :  { %86 = vpush %v93_v19 }
 0x125   :  { %s87_s22 = spop %86 }
 0x126   :  { %s191_s22 = smov (!%p47_p10, %s87_s22), 1.0 }
 0x127   :  { %v58_v23 = vstv %s191_s22 }
 0x128   :  { %v59_v24 = vmul.f32 %v58_v23, %v56_v21  ;;  %v60_v25 = vmul.f32 %v58_v23, %v57_v22 }
 0x12a   :  { %61 = vst [vmem:[#allocation5] sm:$0xff] %v59_v24  ;;  %62 = vst [vmem:[#allocation5 + $0x8] sm:$0xff] %v60_v25 }
 0x12b   :  { %127 = shalt.err (!%p124_p1)
}
 0x12c   :  { %s128_s28 = scalar_lea.hbm %s187_s1, 256 }
 0x12d   :  { %p129_p2 = scmp.ne.s32.totalorder %s187_s1, %s128_s28  ;;  %p132_p3 = scmp.lt.u32.totalorder %s128_s28, %s187_s1 }
 0x12f   :  { %p134_p4 = pnand %p132_p3, %p129_p2 }
 0x131   :  { %137 = shalt.err (!%p134_p4)
}
 0x132   :  { %74 = dma.vmem_to_hbm [thread:$0]  %s69_s24, 256, %s187_s1, [#allocation4], %s143_s16, %s143_s16, %s144_s17  }
 0x133   :  { %140 = dma.done.wait [#allocation4], 256  }
 0x134   :  { %141 = vsyncadd [#allocation4], 4294967040 }
 0x135   :  { %78 = vsyncpa [#allocation3], 1 }
 0x136   :  { %79 = vsyncpa [#allocation4], 1 }

</bundles_post_ra>
